<compile_context>
chip_gen: v7x
topology: tpu7x:2x2x1
jax: 0.10.0
libtpu: 0.0.40
codegen_flags: <defaults>
</compile_context>

<pallas_src>
import functools

import jax
import jax.numpy as jnp
from jax.experimental import pallas as pl
from jax.experimental.pallas import tpu as pltpu


def _round_up(x, m):
    return -(-x // m) * m


# ----------------------------- Pallas kernel --------------------------------

def _global_att_kernel(x_ref, w1_ref, b1_ref, w2_ref, b2_ref, o_ref, acc_ref,
                       *, inv_s, tile_s, spatial_size, masked):
    # x_ref:  (spb, C, tile_s)   spatial tile of the flattened NCHW input
    # w1_ref: (Cin, Cinter)      folded conv1+BN1 weight
    # b1_ref: (1, Cinter)        folded conv1+BN1 bias
    # w2_ref: (Cinter, Cout)     folded conv2+BN2 weight
    # b2_ref: (1, Cout)          folded conv2+BN2 bias
    # o_ref:  (spb, Cout)        result block (resident across the reduction axis)
    # acc_ref:(spb, Cin) f32     running spatial sum
    s = pl.program_id(1)

    @pl.when(s == 0)
    def _():
        acc_ref[...] = jnp.zeros_like(acc_ref)

    x = x_ref[...].astype(jnp.float32)
    if masked:
        # Ragged last spatial tile: Pallas does NOT guarantee zeros in the
        # out-of-bounds part of a block, so zero lanes past the true spatial
        # extent before summing (a few VPU ops, fully hidden under the DMA).
        lane = jax.lax.broadcasted_iota(jnp.int32, x.shape, dimension=2)
        x = jnp.where(s * tile_s + lane < spatial_size, x, 0.0)

    # Partial spatial sum of this tile.
    acc_ref[...] += jnp.sum(x, axis=-1)

    @pl.when(s == pl.num_programs(1) - 1)
    def _():
        pooled = acc_ref[...] * inv_s                                  # mean
        h = jnp.dot(pooled, w1_ref[...],
                    preferred_element_type=jnp.float32) + b1_ref[...]
        h = jnp.maximum(h, 0.0)                                        # ReLU
        o = jnp.dot(h, w2_ref[...],
                    preferred_element_type=jnp.float32) + b2_ref[...]
        o_ref[...] = o.astype(o_ref.dtype)


# ----------------------------- Tiling / VMEM plan ----------------------------

def _vmem_capacity_bytes():
    """Physical VMEM of the current TPU generation (per TensorCore)."""
    try:
        return int(pltpu.get_tpu_info().vmem_capacity_bytes)
    except Exception:
        return 64 * 1024 * 1024          # conservative default = v7x per-core VMEM


def _plan_tiles(N, C, S, elem_bytes, x_buffer_budget):
    """Pick (samples_per_block, tile_s) sized by bytes, not a fixed lane cap."""
    c_pad = _round_up(max(C, 1), 8)      # channel slab is sublane-padded to 8

    # Samples per row block (whole samples only, so the MLP epilogue stays
    # block-local).  Prefer two row blocks -- one per v7x TensorCore -- as long
    # as each block still streams >= ~2 MiB of HBM; otherwise keep one block.
    spb = N
    if N % 2 == 0 and (N // 2) * c_pad * S * elem_bytes >= (2 << 20):
        spb = N // 2

    def buf_bytes(spb_, lanes):
        return spb_ * c_pad * _round_up(lanes, 128) * elem_bytes

    # Shrink the row block (keeping whole samples) if even a 128-lane tile of
    # it would not fit one VMEM buffer.
    while spb > 1 and buf_bytes(spb, min(S, 128)) > x_buffer_budget:
        nxt = spb - 1
        while nxt > 1 and N % nxt != 0:
            nxt -= 1
        spb = max(1, nxt)

    # Spatial tile: largest lane-aligned tile fitting the per-buffer budget;
    # take the full row when it fits (one contiguous DMA per row, no ragged
    # tail, fewer descriptors).
    max_lanes = x_buffer_budget // max(1, spb * c_pad * elem_bytes)
    if max_lanes >= S:
        tile_s = S
    else:
        tile_s = max(128, (max_lanes // 128) * 128)
    return spb, tile_s


# --------------------------------- Wrapper -----------------------------------

def global_att_pallas(x_ncs, w1, b1, w2, b2, *, tile_s=None, samples_per_block=None):
    """x_ncs: (N, C, S) (flattened NCHW).  Returns (N, Cout)."""
    N, C, S = x_ncs.shape
    Cinter = w1.shape[1]
    Cout = w2.shape[1]
    elem_bytes = jnp.dtype(x_ncs.dtype).itemsize

    # Generation-aware VMEM budgeting: leave headroom for compiler scratch and
    # the (tiny) weight / bias / output / accumulator buffers.
    vmem_total = _vmem_capacity_bytes()
    usable = int(vmem_total * 0.7)
    x_buffer_budget = max(2 << 20, (usable - (2 << 20)) // 2)   # per double-buffer

    auto_spb, auto_tile = _plan_tiles(N, C, S, elem_bytes, x_buffer_budget)
    spb = samples_per_block if samples_per_block is not None else auto_spb
    tile_s = tile_s if tile_s is not None else auto_tile
    assert N % spb == 0, (N, spb)

    grid = (N // spb, pl.cdiv(S, tile_s))
    masked = (S % tile_s) != 0           # ragged last spatial tile -> mask in kernel

    c_pad = _round_up(C, 8)
    x_buf = spb * c_pad * _round_up(tile_s, 128) * elem_bytes
    need = 2 * x_buf + (4 << 20)         # double-buffered x + weights/acc/out slack
    vmem_limit = int(min(int(vmem_total * 0.9), max(need, 32 << 20)))

    kernel = functools.partial(
        _global_att_kernel,
        inv_s=1.0 / float(S), tile_s=tile_s, spatial_size=S, masked=masked)

    return pl.pallas_call(
        kernel,
        out_shape=jax.ShapeDtypeStruct((N, Cout), x_ncs.dtype),
        grid_spec=pltpu.PrefetchScalarGridSpec(
            num_scalar_prefetch=0,
            grid=grid,
            in_specs=[
                pl.BlockSpec((spb, C, tile_s), lambda n, s: (n, 0, s)),
                pl.BlockSpec((C, Cinter), lambda n, s: (0, 0)),
                pl.BlockSpec((1, Cinter), lambda n, s: (0, 0)),
                pl.BlockSpec((Cinter, Cout), lambda n, s: (0, 0)),
                pl.BlockSpec((1, Cout), lambda n, s: (0, 0)),
            ],
            out_specs=pl.BlockSpec((spb, Cout), lambda n, s: (n, 0)),
            scratch_shapes=[pltpu.VMEM((spb, C), jnp.float32)],
        ),
        compiler_params=pltpu.CompilerParams(
            dimension_semantics=("parallel", "arbitrary"),
            vmem_limit_bytes=vmem_limit),
    )(x_ncs, w1, b1, w2, b2)


# ----------------------------- Parameter setup -------------------------------

def make_params(key, in_channels, out_channels, ratio, limitation=4):
    inter_channels = max(int(out_channels // ratio), limitation)
    ks = jax.random.split(key, 8)

    def conv_init(k, cin, cout):
        # PyTorch Conv2d default: U(-1/sqrt(fan_in), 1/sqrt(fan_in)), 1x1 kernel
        bound = 1.0 / jnp.sqrt(cin)
        return jax.random.uniform(k, (cout, cin), jnp.float32, -bound, bound)

    w1 = conv_init(ks[0], in_channels, inter_channels)              # (Cinter, Cin)
    cb1 = jax.random.uniform(ks[1], (inter_channels,), jnp.float32, -0.1, 0.1)
    w2 = conv_init(ks[2], inter_channels, out_channels)             # (Cout, Cinter)
    cb2 = jax.random.uniform(ks[3], (out_channels,), jnp.float32, -0.1, 0.1)

    def bn_init(kg, kb, c):
        gamma = 1.0 + 0.1 * jax.random.normal(kg, (c,), jnp.float32)
        beta = 0.1 * jax.random.normal(kb, (c,), jnp.float32)
        mean = jnp.zeros((c,), jnp.float32)
        var = jnp.ones((c,), jnp.float32)
        return gamma, beta, mean, var

    bn1 = bn_init(ks[4], ks[5], inter_channels)
    bn2 = bn_init(ks[6], ks[7], out_channels)
    return (w1, cb1, bn1), (w2, cb2, bn2), inter_channels


def fold_conv_bn(w, b, bn, eps=1e-5):
    """Fold conv(1x1)+BN into (W_folded^T, bias) for x @ W layout."""
    gamma, beta, mean, var = bn
    scale = gamma / jnp.sqrt(var + eps)                 # (Cout,)
    w_folded = w * scale[:, None]                       # (Cout, Cin)
    b_folded = (b - mean) * scale + beta                # (Cout,)
    return w_folded.T, b_folded[None, :]                # (Cin, Cout), (1, Cout)


# ----------------------------- Full module call ------------------------------

def global_att_forward(x_nchw, params):
    (w1, cb1, bn1), (w2, cb2, bn2) = params
    W1, B1 = fold_conv_bn(w1, cb1, bn1)                 # (Cin, Cinter), (1, Cinter)
    W2, B2 = fold_conv_bn(w2, cb2, bn2)                 # (Cinter, Cout), (1, Cout)

    N, C, H, W = x_nchw.shape
    Cout = W2.shape[1]
    # Native NCHW flatten: (N, C, H*W) -- spatial axis to lanes, no transposes,
    # no padding copies.
    x_ncs = x_nchw.reshape(N, C, H * W)
    out = global_att_pallas(x_ncs, W1, B1, W2, B2)
    return out.reshape(N, Cout, 1, 1)                   # matches PyTorch output shape


def global_att_reference(x_nchw, params):
    """Plain-JAX reference (same math) for a sanity check."""
    (w1, cb1, bn1), (w2, cb2, bn2) = params
    W1, B1 = fold_conv_bn(w1, cb1, bn1)
    W2, B2 = fold_conv_bn(w2, cb2, bn2)
    pooled = jnp.mean(x_nchw, axis=(2, 3))              # AdaptiveAvgPool2d(1)
    h = jnp.maximum(pooled @ W1 + B1, 0.0)
    o = h @ W2 + B2
    return o.reshape(x_nchw.shape[0], W2.shape[1], 1, 1)


# ----------------------------------- Main ------------------------------------

if __name__ == "__main__":
    key = jax.random.PRNGKey(0)
    k_x, k_p, k_x2 = jax.random.split(key, 3)

    # Small shapes consistent with the module: NCHW input, 1x1 convs.
    N, Cin, H, W = 2, 4, 16, 16
    Cout, ratio = 8, 4          # inter = max(8//4, 4) = 4

    x = jax.random.normal(k_x, (N, Cin, H, W), jnp.float32)
    (p1, p2, Cinter) = make_params(k_p, Cin, Cout, ratio)
    params = (p1, p2)

    out = jax.block_until_ready(global_att_forward(x, params))
    ref = jax.block_until_ready(global_att_reference(x, params))
    assert out.shape == (N, Cout, 1, 1), out.shape
    assert jnp.allclose(out, ref, atol=1e-5, rtol=1e-5), float(jnp.abs(out - ref).max())

    # Also exercise the multi-step reduction + ragged-tail masking path with a
    # forced small spatial tile (S = 200, tile_s = 128).
    x2 = jax.random.normal(k_x2, (N, Cin, 10, 20), jnp.float32)
    W1, B1 = fold_conv_bn(*p1)
    W2, B2 = fold_conv_bn(*p2)
    out2 = jax.block_until_ready(
        global_att_pallas(x2.reshape(N, Cin, 200), W1, B1, W2, B2, tile_s=128))
    ref2 = global_att_reference(x2, params).reshape(N, Cout)
    assert jnp.allclose(out2, ref2, atol=1e-5, rtol=1e-5), float(jnp.abs(out2 - ref2).max())

    print("KERNEL_OK")
</pallas_src>

<mosaic_0001>
module attributes {stable_mosaic.version = 11 : i64} {
  func.func @_global_att_kernel(%arg0: i32, %arg1: i32, %arg2: memref<2x4x256xf32, #tpu.memory_space<vmem>>, %arg3: memref<4x4xf32, #tpu.memory_space<vmem>>, %arg4: memref<1x4xf32, #tpu.memory_space<vmem>>, %arg5: memref<4x8xf32, #tpu.memory_space<vmem>>, %arg6: memref<1x8xf32, #tpu.memory_space<vmem>>, %arg7: memref<2x8xf32, #tpu.memory_space<vmem>>, %arg8: memref<2x4xf32, #tpu.memory_space<vmem>>) attributes {dimension_semantics = [#tpu.dimension_semantics<parallel>, #tpu.dimension_semantics<arbitrary>], iteration_bounds = array<i64: 1, 1>, scalar_prefetch = 0 : i64, scratch_operands = 1 : i64, tpu.core_type = #tpu.core_type<tc>, window_params = [{transform_indices = @transform_0, window_bounds = array<i64: 2, 4, 256>}, {pipeline_mode = #tpu.pipeline_mode<synchronous>, transform_indices = @transform_1, window_bounds = array<i64: 4, 4>}, {pipeline_mode = #tpu.pipeline_mode<synchronous>, transform_indices = @transform_2, window_bounds = array<i64: 1, 4>}, {pipeline_mode = #tpu.pipeline_mode<synchronous>, transform_indices = @transform_3, window_bounds = array<i64: 4, 8>}, {pipeline_mode = #tpu.pipeline_mode<synchronous>, transform_indices = @transform_4, window_bounds = array<i64: 1, 8>}, {transform_indices = @transform_5, window_bounds = array<i64: 2, 8>}]} {
    %c0_i32 = arith.constant 0 : i32
    %0 = arith.cmpi eq, %arg1, %c0_i32 : i32
    %1 = arith.extui %0 : i1 to i32
    %c0_i32_0 = arith.constant 0 : i32
    %2 = arith.cmpi ne, %1, %c0_i32_0 : i32
    scf.if %2 {
      %cst_9 = arith.constant 0.000000e+00 : f32
      %11 = vector.broadcast %cst_9 : f32 to vector<2x4xf32>
      %c0_10 = arith.constant 0 : index
      %c0_11 = arith.constant 0 : index
      %12 = vector.load %arg8[%c0_10, %c0_11] : memref<2x4xf32, #tpu.memory_space<vmem>>, vector<2x4xf32>
      tpu.vector_store %arg8[%c0_10, %c0_11], %11 {strides = array<i32>} : memref<2x4xf32, #tpu.memory_space<vmem>>, vector<2x4xf32>,
    } else {
    }
    %c0 = arith.constant 0 : index
    %c0_1 = arith.constant 0 : index
    %c0_2 = arith.constant 0 : index
    %3 = vector.load %arg2[%c0, %c0_1, %c0_2] : memref<2x4x256xf32, #tpu.memory_space<vmem>>, vector<2x4x256xf32>
    %c0_3 = arith.constant 0 : index
    %c0_4 = arith.constant 0 : index
    %4 = vector.load %arg8[%c0_3, %c0_4] : memref<2x4xf32, #tpu.memory_space<vmem>>, vector<2x4xf32>
    %cst = arith.constant dense<0.000000e+00> : vector<2x4xf32>
    %5 = vector.multi_reduction <add>, %3, %cst [2] : vector<2x4x256xf32> to vector<2x4xf32>
    %6 = arith.addf %4, %5 : vector<2x4xf32>
    %c0_5 = arith.constant 0 : index
    %c0_6 = arith.constant 0 : index
    %7 = vector.load %arg8[%c0_5, %c0_6] : memref<2x4xf32, #tpu.memory_space<vmem>>, vector<2x4xf32>
    tpu.vector_store %arg8[%c0_5, %c0_6], %6 {strides = array<i32>} : memref<2x4xf32, #tpu.memory_space<vmem>>, vector<2x4xf32>,
    %c0_i32_7 = arith.constant 0 : i32
    %8 = arith.cmpi eq, %arg1, %c0_i32_7 : i32
    %9 = arith.extui %8 : i1 to i32
    %c0_i32_8 = arith.constant 0 : i32
    %10 = arith.cmpi ne, %9, %c0_i32_8 : i32
    scf.if %10 {
      %c0_9 = arith.constant 0 : index
      %c0_10 = arith.constant 0 : index
      %11 = vector.load %arg8[%c0_9, %c0_10] : memref<2x4xf32, #tpu.memory_space<vmem>>, vector<2x4xf32>
      %cst_11 = arith.constant 3.906250e-03 : f32
      %12 = vector.broadcast %cst_11 : f32 to vector<2x4xf32>
      %13 = arith.mulf %11, %12 : vector<2x4xf32>
      %c0_12 = arith.constant 0 : index
      %c0_13 = arith.constant 0 : index
      %14 = vector.load %arg3[%c0_12, %c0_13] : memref<4x4xf32, #tpu.memory_space<vmem>>, vector<4x4xf32>
      %cst_14 = arith.constant dense<0.000000e+00> : vector<2x4xf32>
      %15 = tpu.matmul %13, %14, %cst_14 {dimension_numbers = #tpu.dot_dimension_numbers<[1], [0], [0], [1], [0, 0, 1, 1], [], []>} : vector<2x4xf32>, vector<4x4xf32>, vector<2x4xf32> -> vector<2x4xf32>
      %c0_15 = arith.constant 0 : index
      %c0_16 = arith.constant 0 : index
      %16 = vector.load %arg4[%c0_15, %c0_16] : memref<1x4xf32, #tpu.memory_space<vmem>>, vector<1x4xf32>
      %17 = vector.broadcast %16 : vector<1x4xf32> to vector<2x4xf32>
      %18 = arith.addf %15, %17 : vector<2x4xf32>
      %cst_17 = arith.constant 0.000000e+00 : f32
      %19 = vector.broadcast %cst_17 : f32 to vector<2x4xf32>
      %20 = arith.maximumf %18, %19 : vector<2x4xf32>
      %c0_18 = arith.constant 0 : index
      %c0_19 = arith.constant 0 : index
      %21 = vector.load %arg5[%c0_18, %c0_19] : memref<4x8xf32, #tpu.memory_space<vmem>>, vector<4x8xf32>
      %cst_20 = arith.constant dense<0.000000e+00> : vector<2x8xf32>
      %22 = tpu.matmul %20, %21, %cst_20 {dimension_numbers = #tpu.dot_dimension_numbers<[1], [0], [0], [1], [0, 0, 1, 1], [], []>} : vector<2x4xf32>, vector<4x8xf32>, vector<2x8xf32> -> vector<2x8xf32>
      %c0_21 = arith.constant 0 : index
      %c0_22 = arith.constant 0 : index
      %23 = vector.load %arg6[%c0_21, %c0_22] : memref<1x8xf32, #tpu.memory_space<vmem>>, vector<1x8xf32>
      %24 = vector.broadcast %23 : vector<1x8xf32> to vector<2x8xf32>
      %25 = arith.addf %22, %24 : vector<2x8xf32>
      %c0_23 = arith.constant 0 : index
      %c0_24 = arith.constant 0 : index
      %26 = vector.load %arg7[%c0_23, %c0_24] : memref<2x8xf32, #tpu.memory_space<vmem>>, vector<2x8xf32>
      tpu.vector_store %arg7[%c0_23, %c0_24], %25 {strides = array<i32>} : memref<2x8xf32, #tpu.memory_space<vmem>>, vector<2x8xf32>,
    } else {
    }
    return
  }
  func.func @transform_0(%arg0: i32, %arg1: i32) -> (i32, i32, i32) {
    %c0_i32 = arith.constant 0 : i32
    %c0_i32_0 = arith.constant 0 : i32
    return %arg0, %c0_i32, %arg1 : i32, i32, i32
  }
  func.func @transform_1(%arg0: i32, %arg1: i32) -> (i32, i32) {
    %c0_i32 = arith.constant 0 : i32
    %c0_i32_0 = arith.constant 0 : i32
    %c0_i32_1 = arith.constant 0 : i32
    return %c0_i32, %c0_i32_0 : i32, i32
  }
  func.func @transform_2(%arg0: i32, %arg1: i32) -> (i32, i32) {
    %c0_i32 = arith.constant 0 : i32
    %c0_i32_0 = arith.constant 0 : i32
    %c0_i32_1 = arith.constant 0 : i32
    return %c0_i32, %c0_i32_0 : i32, i32
  }
  func.func @transform_3(%arg0: i32, %arg1: i32) -> (i32, i32) {
    %c0_i32 = arith.constant 0 : i32
    %c0_i32_0 = arith.constant 0 : i32
    %c0_i32_1 = arith.constant 0 : i32
    return %c0_i32, %c0_i32_0 : i32, i32
  }
  func.func @transform_4(%arg0: i32, %arg1: i32) -> (i32, i32) {
    %c0_i32 = arith.constant 0 : i32
    %c0_i32_0 = arith.constant 0 : i32
    %c0_i32_1 = arith.constant 0 : i32
    return %c0_i32, %c0_i32_0 : i32, i32
  }
  func.func @transform_5(%arg0: i32, %arg1: i32) -> (i32, i32) {
    %c0_i32 = arith.constant 0 : i32
    %c0_i32_0 = arith.constant 0 : i32
    return %arg0, %c0_i32 : i32, i32
  }
}

</mosaic_0001>

<bundles_post_ra>
// kernel: tpu_custom_call.1
= control target key start
LH: loop header
LB: loop body
LE: loop exit
PB: predicated region body
PF: predicated region fallthrough
CT: control target
= control target key end

     0   :  { %10 = vsyncpa [#allocation4], 0  ;;  %s475_s0 = inlined_call_operand.hbm [shape: f32[2,4,256], index: 0, kind: input, shape index: {}]   ;;  %s476_s1 = inlined_call_operand.hbm [shape: f32[4,4], index: 1, kind: input, shape index: {}]   ;;  %s477_s2 = inlined_call_operand.vmem [shape: f32[1,4], index: 2, kind: input, shape index: {}]   ;;  %s478_s3 = inlined_call_operand.vmem [shape: f32[4,8], index: 3, kind: input, shape index: {}]   ;;  %s479_s4 = inlined_call_operand.vmem [shape: f32[1,8], index: 4, kind: input, shape index: {}]   ;;  %s480_s5 = inlined_call_operand.hbm [shape: f32[2,8], index: 5, kind: output, shape index: {}]  }
   0x1   :  { %11 = vsyncpa [#allocation7], 0 }
   0x2   :  { %12 = vsyncpa [#allocation5], 0  ;;  %s385_s18 = smov [#allocation3]   ;;  %s313_s22 = scalar_lea.hbm %s475_s0, 256 }
   0x3   :  { %s18_s19 = sshll.u32 %s385_s18, 4  ;;  %p314_p0 = scmp.ne.s32.totalorder %s475_s0, %s313_s22  ;;  %s19_s19 = int_to_ptr.vmem [resolvable:$true] %s18_s19 }
   0x4   :  { %p317_p1 = scmp.lt.u32.totalorder %s313_s22, %s475_s0 }
   0x6   :  { %p319_p2 = pnand %p317_p1, %p314_p0 }
   0x8   :  { %322 = shalt.err (!%p319_p2)
}
   0x9   :  { %s323_s27 = scalar_lea.vmem %s19_s19, 256  ;;  %p328_p4 = scmp.lt.s32.totalorder %s19_s19, %s19_s19 }
   0xa   :  { %p324_p3 = scmp.ne.s32.totalorder %s19_s19, %s323_s27  ;;  %p329_p5 = scmp.lt.s32.totalorder %s323_s27, %s323_s27 }
   0xc   :  { %p330_p6 = por %p329_p5, %p328_p4 }
   0xe   :  { %p331_p7 = pnand %p330_p6, %p324_p3 }
  0x10   :  { %334 = shalt.err (!%p331_p7)
}
  0x11   :  { %s386_s28 = smov 128   ;;  %s387_s29 = smov 8  }
  0x12   :  { %24 = dma.hbm_to_vmem [thread:$0]  %s475_s0, 256, %s19_s19, [#allocation4], %s386_s28, %s386_s28, %s387_s29  }
  0x13   :  { %s388_s7 = smov [#allocation6]   ;;  %s335_s11 = scalar_lea.hbm %s476_s1, 64 }
  0x14   :  { %s31_s8 = sshll.u32 %s388_s7, 4  ;;  %p336_p8 = scmp.ne.s32.totalorder %s476_s1, %s335_s11  ;;  %s32_s8 = int_to_ptr.vmem [resolvable:$true] %s31_s8 }
  0x15   :  { %p339_p9 = scmp.lt.u32.totalorder %s335_s11, %s476_s1 }
  0x17   :  { %p341_p10 = pnand %p339_p9, %p336_p8 }
  0x19   :  { %344 = shalt.err (!%p341_p10)
}
  0x1a   :  { %s345_s16 = scalar_lea.vmem %s32_s8, 64  ;;  %p350_p12 = scmp.lt.s32.totalorder %s32_s8, %s32_s8 }
  0x1b   :  { %p346_p11 = scmp.ne.s32.totalorder %s32_s8, %s345_s16  ;;  %p351_p13 = scmp.lt.s32.totalorder %s345_s16, %s345_s16 }
  0x1d   :  { %p352_p0 = por %p351_p13, %p350_p12 }
  0x1f   :  { %p353_p1 = pnand %p352_p0, %p346_p11 }
  0x21   :  { %356 = shalt.err (!%p353_p1)
}
  0x22   :  { %34 = dma.hbm_to_vmem [thread:$0]  %s476_s1, 64, %s32_s8, [#allocation7]  }
  0x23   :  { %379 = dma.done.wait [#allocation4], 256  }
  0x24   :  { %380 = vsyncadd [#allocation4], 4294967040 }
  0x25   :  { %381 = dma.done.wait [#allocation7], 64  }
  0x26   :  { %382 = vsyncadd [#allocation7], 4294967232  ;;  %vm62_vm0 = vcmask 1043456   ;;  %v53_v0 = vld [vmem:[#allocation3] sm:$0xff]  ;;  %v54_v1 = vld [vmem:[#allocation3 + $0x8] sm:$0xff]  ;;  %vm51_vm1 = vcmask 25600   ;;  %v75_v12 = vlaneseq }
  0x27   :  { %v58_v2 = vcombine.high %v53_v0, %v53_v0  ;;  %v63_v3 = vsel %vm62_vm0, %v53_v0, 0.0  ;;  %v59_v4 = vcombine.high %v54_v1, %v54_v1  ;;  %v68_v6 = vsel %vm62_vm0, %v54_v1, 0.0  ;;  %v96_v11 = vld [vmem:[#allocation6] sm:$0xf]  ;;  %v182_v25 = vld [vmem:[%s478_s3] sm:$0xf] }
  0x28   :  { %v389_v10 = vmov 0.0   ;;  %vm390_vm2 = vmmov 0   ;;  %v76_v13 = vand.u32 127, %v75_v12  ;;  %v78_v14 = vshrl.u32 %v75_v12, 7  ;;  %v284_v26 = vld [vmem:[%s477_s2] ss:$0 sm:$0xff] }
  0x29   :  { %v64_v5 = vsel %vm62_vm0, %v58_v2, 0.0  ;;  %v69_v7 = vsel %vm62_vm0, %v59_v4, 0.0  ;;  %52 = vst.msk [vmem:[#allocation2] sm:$0x3] %vm51_vm1, %v389_v10  ;;  %294 = vmatprep.subr.mxu0 %v389_v10  ;;  %299 = vmatprep.subr.mxu1 %v389_v10  ;;  %vm85_vm3 = vcmask 1041409   ;;  %vm104_vm4 = vcmask 31744  }
  0x2a   :  { %v65_v8 = vadd.f32 %v64_v5, %v63_v3  ;;  %v70_v9 = vadd.f32 %v69_v7, %v68_v6  ;;  %295 = vmatpush3.msk.msra.mxu0 %vm62_vm0, %v96_v11  ;;  %296 = vmatprep.mubr.msk.f32.mxu0 %vm390_vm2, %v389_v10  ;;  %v79_v16 = vsub.s32 %v76_v13, %v78_v14  ;;  %v287_v31 = vld [vmem:[%s479_s4] ss:$0 sm:$0xff]  ;;  %s391_s23 = smov [#allocation8]   ;;  %vm266_vm5 = vcmask 58368  }
  0x2b   :  { %301 = vmatprep.mubr.msk.f32.mxu1 %vm390_vm2, %v389_v10  ;;  %300 = vmatpush3.msk.msra.mxu1 %vm62_vm0, %v182_v25  ;;  %s274_s24 = sshll.u32 %s391_s23, 4  ;;  %s275_s24 = int_to_ptr.vmem [resolvable:$true] %s274_s24 }
  0x2c   :  { %66 = vadd.xlane.f32.xlu0 %v65_v8  ;;  %s357_s3 = scalar_lea.vmem %s275_s24, 32  ;;  %p362_p3 = scmp.lt.s32.totalorder %s275_s24, %s275_s24 }
  0x2d   :  { %p358_p2 = scmp.ne.s32.totalorder %s275_s24, %s357_s3  ;;  %p363_p4 = scmp.lt.s32.totalorder %s357_s3, %s357_s3 }
  0x2f   :  { %p364_p5 = por %p363_p4, %p362_p3 }
  0x30   :  { %71 = vadd.xlane.f32.xlu0 %v70_v9  ;;  %v55_v20 = vld [vmem:[#allocation2] sm:$0x3] }
  0x31   :  { %p365_p6 = pnand %p364_p5, %p358_p2 }
  0xb9   :  { %v67_v15 = vpop.xlane.xlu0 %66 }
  0xba   :  { %v80_v18 = vrot.slane %v67_v15, %v79_v16 }
  0xbd   :  { %v72_v17 = vpop.xlane.xlu0 %71 }
  0xbe   :  { %v84_v19 = vrot.slane %v72_v17, %v79_v16 }
  0xc0   :  { %v86_v21 = vsel %vm85_vm3, %v84_v19, %v80_v18 }
  0xc1   :  { %v88_v22 = vadd.f32 %v86_v21, %v55_v20 }
  0xc3   :  { %90 = vst.msk [vmem:[#allocation2] sm:$0x3] %vm51_vm1, %v88_v22 }
  0xca   :  { %v94_v23 = vld [vmem:[#allocation2] sm:$0x3] }
  0xcb   :  { %v95_v24 = vmul.f32 0.00390625, %v94_v23 }
  0xcd   :  { %297 = vmatmul.mubr.msk.f32.vlgmr.msra.gmra.mrb[0].mxu0 %vm104_vm4, %v95_v24 }
 0x1a0   :  { %v177_v27 = vpop.f32.mrb[0].mxu0 }
 0x1a1   :  { %v178_v28 = vadd.f32 %v284_v26, %v177_v27  ;;  %v298_v29 = vpop.f32.mrb[1].mxu0 }
 0x1a3   :  { %v181_v30 = vmax.f32 %v178_v28, 0.0 }
 0x1a5   :  { %302 = vmatmul.mubr.msk.f32.vlgmr.msra.gmra.mrb[0].mxu1 %vm104_vm4, %v181_v30 }
 0x278   :  { %v262_v32 = vpop.f32.mrb[0].mxu1 }
 0x279   :  { %v263_v33 = vadd.f32 %v287_v31, %v262_v32  ;;  %v303_v34 = vpop.f32.mrb[1].mxu1 }
 0x27b   :  { %267 = vst.msk [vmem:[#allocation8] sm:$0x3] %vm266_vm5, %v263_v33 }
 0x27c   :  { %368 = shalt.err (!%p365_p6)
}
 0x27d   :  { %s369_s26 = scalar_lea.hbm %s480_s5, 32 }
 0x27e   :  { %p370_p7 = scmp.ne.s32.totalorder %s480_s5, %s369_s26  ;;  %p373_p8 = scmp.lt.u32.totalorder %s369_s26, %s480_s5 }
 0x280   :  { %p375_p9 = pnand %p373_p8, %p370_p7 }
 0x282   :  { %378 = shalt.err (!%p375_p9)
}
 0x283   :  { %277 = dma.vmem_to_hbm [thread:$0]  %s275_s24, 32, %s480_s5, [#allocation5]  }
 0x284   :  { %383 = dma.done.wait [#allocation5], 32  }
 0x285   :  { %384 = vsyncadd [#allocation5], 4294967264 }
 0x286   :  { %281 = vsyncpa [#allocation4], 1 }
 0x287   :  { %282 = vsyncpa [#allocation7], 1 }
 0x288   :  { %283 = vsyncpa [#allocation5], 1 }

</bundles_post_ra>
